<compile_context>
chip_gen: v5e
topology: v5e:2x2
jax: 0.10.0
libtpu: 0.0.40
codegen_flags: <defaults>
</compile_context>

<pallas_src>
import jax
import jax.numpy as jnp
from jax import lax
from jax.experimental import pallas as pl
from jax.experimental.pallas import tpu as pltpu

NEURONS_PER_LAYER_GENERATOR = 256
BN_EPS = 0.8            # nn.BatchNorm1d(n, 0.8) -> second positional arg is eps
LRELU_SLOPE = 0.25


def _round_up(x, m):
    return ((x + m - 1) // m) * m


def _bn_lrelu(h, g_ref, b_ref):
    """Training-mode BatchNorm1d (biased batch var) fused into one scale/shift,
    followed by LeakyReLU(0.25). Single reduction pass over the batch axis."""
    inv_n = 1.0 / h.shape[0]
    mean = jnp.sum(h, axis=0, keepdims=True) * inv_n
    ex2 = jnp.sum(h * h, axis=0, keepdims=True) * inv_n
    var = ex2 - mean * mean
    scale = g_ref[...] * lax.rsqrt(var + BN_EPS)          # (1, C)
    shift = b_ref[...] - mean * scale                     # (1, C)
    hn = h * scale + shift
    return jnp.where(hn >= 0, hn, LRELU_SLOPE * hn)


def _generator_kernel(kp_ref, nz_ref,
                      w1k_ref, w1n_ref, g1_ref, b1_ref,
                      w2_ref, g2_ref, b2_ref,
                      w3_ref, g3_ref, b3_ref,
                      w4_ref,
                      out_ref):
    """One grid step = one independent BatchNorm minibatch; weights resident."""
    kp = kp_ref[0]    # (B, 2J)
    z = nz_ref[0]     # (B, nz)

    # Fused concat: x @ W1 == kp @ W1[:2J] + noise @ W1[2J:]
    h1 = (jnp.dot(kp, w1k_ref[...], preferred_element_type=jnp.float32)
          + jnp.dot(z, w1n_ref[...], preferred_element_type=jnp.float32))
    h1 = _bn_lrelu(h1, g1_ref, b1_ref)
    h2 = _bn_lrelu(jnp.dot(h1, w2_ref[...], preferred_element_type=jnp.float32),
                   g2_ref, b2_ref)
    h3 = _bn_lrelu(jnp.dot(h2, w3_ref[...], preferred_element_type=jnp.float32),
                   g3_ref, b3_ref)
    # w4 is zero-padded on its output columns to a lane-dense width (>=128),
    # so this store is unmasked; the wrapper slices back to image_size.
    out_ref[0] = jnp.dot(h3, w4_ref[...], preferred_element_type=jnp.float32)


def init_generator_params(key, num_joints, nz):
    """Logical params matching the PyTorch module. Linear weights use PyTorch's
    default U(-1/sqrt(fan_in), 1/sqrt(fan_in)), stored transposed as (in, out).
    BatchNorm gamma=1, beta=0, shape (1, C)."""
    image_size = num_joints * 2
    d_in = image_size + nz
    h = NEURONS_PER_LAYER_GENERATOR
    dims = [(d_in, h), (h, h // 2), (h // 2, h), (h, image_size)]

    params = {}
    keys = jax.random.split(key, len(dims))
    for i, ((fan_in, fan_out), k) in enumerate(zip(dims, keys), start=1):
        bound = 1.0 / jnp.sqrt(jnp.float32(fan_in))
        params[f"w{i}"] = jax.random.uniform(
            k, (fan_in, fan_out), dtype=jnp.float32, minval=-bound, maxval=bound)
    for i, (_, fan_out) in enumerate(dims[:3], start=1):
        params[f"g{i}"] = jnp.ones((1, fan_out), dtype=jnp.float32)
        params[f"b{i}"] = jnp.zeros((1, fan_out), dtype=jnp.float32)
    return params


def prepare_generator_params(params, num_joints, nz):
    """One-time layout prep for the kernel: split w1 rows (fused concat) and
    zero-pad w4's output columns to a multiple of 128 lanes."""
    image_size = num_joints * 2
    out_pad = _round_up(image_size, 128)
    w1 = params["w1"]
    return {
        "w1k": w1[:image_size],          # (2J, 256)
        "w1n": w1[image_size:],          # (nz, 256)
        "g1": params["g1"], "b1": params["b1"],
        "w2": params["w2"], "g2": params["g2"], "b2": params["b2"],
        "w3": params["w3"], "g3": params["g3"], "b3": params["b3"],
        "w4": jnp.pad(params["w4"], ((0, 0), (0, out_pad - image_size))),
    }


def generator_forward_grouped(keypoints, noise, kparams):
    """keypoints: (G, B, 2J), noise: (G, B, nz). Each group g is an INDEPENDENT
    minibatch — BatchNorm statistics are computed per group, matching
    per-minibatch PyTorch semantics. All G groups share one pallas_call so the
    weights are DMA'd to VMEM once and stay resident across the grid."""
    keypoints = keypoints.astype(jnp.float32)
    noise = noise.astype(jnp.float32)
    G, B, two_j = keypoints.shape
    nz = noise.shape[-1]
    out_pad = kparams["w4"].shape[-1]
    h = NEURONS_PER_LAYER_GENERATOR

    weights = (kparams["w1k"], kparams["w1n"], kparams["g1"], kparams["b1"],
               kparams["w2"], kparams["g2"], kparams["b2"],
               kparams["w3"], kparams["g3"], kparams["b3"],
               kparams["w4"])

    # Constant index_map -> block index never changes -> weights stay in VMEM
    # for the whole grid (no per-step re-DMA).
    const_spec = lambda a: pl.BlockSpec(a.shape, lambda g: (0, 0))

    flops = 2 * G * B * (two_j * h + nz * h + h * (h // 2) + (h // 2) * h + h * out_pad)
    bytes_accessed = int(
        sum(int(a.size) * a.dtype.itemsize for a in weights)
        + int(keypoints.size) * 4 + int(noise.size) * 4 + G * B * out_pad * 4)

    out = pl.pallas_call(
        _generator_kernel,
        out_shape=jax.ShapeDtypeStruct((G, B, out_pad), jnp.float32),
        grid=(G,),
        in_specs=[pl.BlockSpec((1, B, two_j), lambda g: (g, 0, 0)),
                  pl.BlockSpec((1, B, nz), lambda g: (g, 0, 0))]
                 + [const_spec(a) for a in weights],
        out_specs=pl.BlockSpec((1, B, out_pad), lambda g: (g, 0, 0)),
        compiler_params=pltpu.CompilerParams(
            dimension_semantics=("parallel",)),
        cost_estimate=pl.CostEstimate(
            flops=flops, transcendentals=0, bytes_accessed=bytes_accessed),
    )(keypoints, noise, *weights)

    # Slice the lane padding back off (layout plumbing only; padded w4 columns
    # are zero so the extra outputs are exactly zero).
    return out[..., :two_j]


def generator_forward(batch_of_keypoints_cropped, noise, kparams):
    """Single-minibatch forward, identical semantics to the PyTorch module."""
    out = generator_forward_grouped(batch_of_keypoints_cropped[None],
                                    noise[None], kparams)
    return out[0]


def generator_reference(batch_of_keypoints_cropped, noise, params):
    """Pure-JAX reference (two-pass BN, explicit concat) for correctness."""
    x = jnp.concatenate([batch_of_keypoints_cropped, noise], axis=-1)

    def bn_lrelu(h, g, b):
        mean = jnp.mean(h, axis=0, keepdims=True)
        var = jnp.mean((h - mean) ** 2, axis=0, keepdims=True)
        hn = (h - mean) / jnp.sqrt(var + BN_EPS) * g + b
        return jnp.where(hn >= 0, hn, LRELU_SLOPE * hn)

    h = bn_lrelu(x @ params["w1"], params["g1"], params["b1"])
    h = bn_lrelu(h @ params["w2"], params["g2"], params["b2"])
    h = bn_lrelu(h @ params["w3"], params["g3"], params["b3"])
    return h @ params["w4"]


if __name__ == "__main__":
    num_joints = 16          # image_size = 32
    nz = 32
    batch = 8                # one BatchNorm minibatch
    groups = 4               # independent minibatches processed per pallas_call

    key = jax.random.PRNGKey(0)
    k_kp, k_noise, k_params = jax.random.split(key, 3)

    keypoints = jax.random.normal(
        k_kp, (groups, batch, num_joints * 2), dtype=jnp.float32)
    noise = jax.random.normal(k_noise, (groups, batch, nz), dtype=jnp.float32)

    params = init_generator_params(k_params, num_joints, nz)
    kparams = prepare_generator_params(params, num_joints, nz)   # one-time prep

    # Grouped call: G independent minibatches share one kernel launch; weights
    # are kept resident in VMEM across the grid.
    out = jax.block_until_ready(generator_forward_grouped(keypoints, noise, kparams))
    assert out.shape == (groups, batch, num_joints * 2)
    ref = jnp.stack([generator_reference(keypoints[g], noise[g], params)
                     for g in range(groups)])
    assert jnp.allclose(out, ref, atol=1e-3, rtol=1e-3), "grouped mismatch vs reference"

    # Single-minibatch call (exact PyTorch forward semantics).
    out1 = jax.block_until_ready(generator_forward(keypoints[0], noise[0], kparams))
    ref1 = generator_reference(keypoints[0], noise[0], params)
    assert out1.shape == (batch, num_joints * 2)
    assert jnp.allclose(out1, ref1, atol=1e-3, rtol=1e-3), "single-batch mismatch vs reference"

    print("KERNEL_OK")
</pallas_src>

<mosaic_0001>
module attributes {stable_mosaic.version = 11 : i64} {
  func.func @_generator_kernel(%arg0: i32, %arg1: memref<1x8x32xf32, #tpu.memory_space<vmem>>, %arg2: memref<1x8x32xf32, #tpu.memory_space<vmem>>, %arg3: memref<32x256xf32, #tpu.memory_space<vmem>>, %arg4: memref<32x256xf32, #tpu.memory_space<vmem>>, %arg5: memref<1x256xf32, #tpu.memory_space<vmem>>, %arg6: memref<1x256xf32, #tpu.memory_space<vmem>>, %arg7: memref<256x128xf32, #tpu.memory_space<vmem>>, %arg8: memref<1x128xf32, #tpu.memory_space<vmem>>, %arg9: memref<1x128xf32, #tpu.memory_space<vmem>>, %arg10: memref<128x256xf32, #tpu.memory_space<vmem>>, %arg11: memref<1x256xf32, #tpu.memory_space<vmem>>, %arg12: memref<1x256xf32, #tpu.memory_space<vmem>>, %arg13: memref<256x128xf32, #tpu.memory_space<vmem>>, %arg14: memref<1x8x128xf32, #tpu.memory_space<vmem>>) attributes {dimension_semantics = [#tpu.dimension_semantics<parallel>], iteration_bounds = array<i64: 4>, scalar_prefetch = 0 : i64, scratch_operands = 0 : i64, tpu.core_type = #tpu.core_type<tc>, window_params = [{transform_indices = @transform_0, window_bounds = array<i64: 1, 8, 32>}, {transform_indices = @transform_1, window_bounds = array<i64: 1, 8, 32>}, {pipeline_mode = #tpu.pipeline_mode<synchronous>, transform_indices = @transform_2, window_bounds = array<i64: 32, 256>}, {pipeline_mode = #tpu.pipeline_mode<synchronous>, transform_indices = @transform_3, window_bounds = array<i64: 32, 256>}, {pipeline_mode = #tpu.pipeline_mode<synchronous>, transform_indices = @transform_4, window_bounds = array<i64: 1, 256>}, {pipeline_mode = #tpu.pipeline_mode<synchronous>, transform_indices = @transform_5, window_bounds = array<i64: 1, 256>}, {pipeline_mode = #tpu.pipeline_mode<synchronous>, transform_indices = @transform_6, window_bounds = array<i64: 256, 128>}, {pipeline_mode = #tpu.pipeline_mode<synchronous>, transform_indices = @transform_7, window_bounds = array<i64: 1, 128>}, {pipeline_mode = #tpu.pipeline_mode<synchronous>, transform_indices = @transform_8, window_bounds = array<i64: 1, 128>}, {pipeline_mode = #tpu.pipeline_mode<synchronous>, transform_indices = @transform_9, window_bounds = array<i64: 128, 256>}, {pipeline_mode = #tpu.pipeline_mode<synchronous>, transform_indices = @transform_10, window_bounds = array<i64: 1, 256>}, {pipeline_mode = #tpu.pipeline_mode<synchronous>, transform_indices = @transform_11, window_bounds = array<i64: 1, 256>}, {pipeline_mode = #tpu.pipeline_mode<synchronous>, transform_indices = @transform_12, window_bounds = array<i64: 256, 128>}, {transform_indices = @transform_13, window_bounds = array<i64: 1, 8, 128>}]} {
    %c0 = arith.constant 0 : index
    %c0_0 = arith.constant 0 : index
    %c0_1 = arith.constant 0 : index
    %0 = vector.load %arg1[%c0, %c0_0, %c0_1] : memref<1x8x32xf32, #tpu.memory_space<vmem>>, vector<1x8x32xf32>
    %1 = vector.shape_cast %0 : vector<1x8x32xf32> to vector<8x32xf32>
    %c0_2 = arith.constant 0 : index
    %c0_3 = arith.constant 0 : index
    %c0_4 = arith.constant 0 : index
    %2 = vector.load %arg2[%c0_2, %c0_3, %c0_4] : memref<1x8x32xf32, #tpu.memory_space<vmem>>, vector<1x8x32xf32>
    %3 = vector.shape_cast %2 : vector<1x8x32xf32> to vector<8x32xf32>
    %c0_5 = arith.constant 0 : index
    %c0_6 = arith.constant 0 : index
    %4 = vector.load %arg3[%c0_5, %c0_6] : memref<32x256xf32, #tpu.memory_space<vmem>>, vector<32x256xf32>
    %cst = arith.constant dense<0.000000e+00> : vector<8x256xf32>
    %5 = tpu.matmul %1, %4, %cst {dimension_numbers = #tpu.dot_dimension_numbers<[1], [0], [0], [1], [0, 0, 1, 1], [], []>} : vector<8x32xf32>, vector<32x256xf32>, vector<8x256xf32> -> vector<8x256xf32>
    %c0_7 = arith.constant 0 : index
    %c0_8 = arith.constant 0 : index
    %6 = vector.load %arg4[%c0_7, %c0_8] : memref<32x256xf32, #tpu.memory_space<vmem>>, vector<32x256xf32>
    %cst_9 = arith.constant dense<0.000000e+00> : vector<8x256xf32>
    %7 = tpu.matmul %3, %6, %cst_9 {dimension_numbers = #tpu.dot_dimension_numbers<[1], [0], [0], [1], [0, 0, 1, 1], [], []>} : vector<8x32xf32>, vector<32x256xf32>, vector<8x256xf32> -> vector<8x256xf32>
    %8 = arith.addf %5, %7 : vector<8x256xf32>
    %cst_10 = arith.constant dense<0.000000e+00> : vector<256xf32>
    %9 = vector.multi_reduction <add>, %8, %cst_10 [0] : vector<8x256xf32> to vector<256xf32>
    %10 = vector.shape_cast %9 : vector<256xf32> to vector<1x256xf32>
    %cst_11 = arith.constant 1.250000e-01 : f32
    %11 = vector.broadcast %cst_11 : f32 to vector<1x256xf32>
    %12 = arith.mulf %10, %11 : vector<1x256xf32>
    %13 = arith.mulf %8, %8 : vector<8x256xf32>
    %cst_12 = arith.constant dense<0.000000e+00> : vector<256xf32>
    %14 = vector.multi_reduction <add>, %13, %cst_12 [0] : vector<8x256xf32> to vector<256xf32>
    %15 = vector.shape_cast %14 : vector<256xf32> to vector<1x256xf32>
    %cst_13 = arith.constant 1.250000e-01 : f32
    %16 = vector.broadcast %cst_13 : f32 to vector<1x256xf32>
    %17 = arith.mulf %15, %16 : vector<1x256xf32>
    %18 = arith.mulf %12, %12 : vector<1x256xf32>
    %19 = arith.subf %17, %18 : vector<1x256xf32>
    %c0_14 = arith.constant 0 : index
    %c0_15 = arith.constant 0 : index
    %20 = vector.load %arg5[%c0_14, %c0_15] : memref<1x256xf32, #tpu.memory_space<vmem>>, vector<1x256xf32>
    %cst_16 = arith.constant 8.000000e-01 : f32
    %21 = vector.broadcast %cst_16 : f32 to vector<1x256xf32>
    %22 = arith.addf %19, %21 : vector<1x256xf32>
    %23 = math.rsqrt %22 : vector<1x256xf32>
    %24 = arith.mulf %20, %23 : vector<1x256xf32>
    %c0_17 = arith.constant 0 : index
    %c0_18 = arith.constant 0 : index
    %25 = vector.load %arg6[%c0_17, %c0_18] : memref<1x256xf32, #tpu.memory_space<vmem>>, vector<1x256xf32>
    %26 = arith.mulf %12, %24 : vector<1x256xf32>
    %27 = arith.subf %25, %26 : vector<1x256xf32>
    %28 = vector.broadcast %24 : vector<1x256xf32> to vector<8x256xf32>
    %29 = arith.mulf %8, %28 : vector<8x256xf32>
    %30 = vector.broadcast %27 : vector<1x256xf32> to vector<8x256xf32>
    %31 = arith.addf %29, %30 : vector<8x256xf32>
    %cst_19 = arith.constant 0.000000e+00 : f32
    %32 = vector.broadcast %cst_19 : f32 to vector<8x256xf32>
    %33 = arith.cmpf oge, %31, %32 : vector<8x256xf32>
    %cst_20 = arith.constant 2.500000e-01 : f32
    %34 = vector.broadcast %cst_20 : f32 to vector<8x256xf32>
    %35 = arith.mulf %34, %31 : vector<8x256xf32>
    %36 = arith.select %33, %31, %35 : vector<8x256xi1>, vector<8x256xf32>
    %c0_21 = arith.constant 0 : index
    %c0_22 = arith.constant 0 : index
    %37 = vector.load %arg7[%c0_21, %c0_22] : memref<256x128xf32, #tpu.memory_space<vmem>>, vector<256x128xf32>
    %cst_23 = arith.constant dense<0.000000e+00> : vector<8x128xf32>
    %38 = tpu.matmul %36, %37, %cst_23 {dimension_numbers = #tpu.dot_dimension_numbers<[1], [0], [0], [1], [0, 0, 1, 1], [], []>} : vector<8x256xf32>, vector<256x128xf32>, vector<8x128xf32> -> vector<8x128xf32>
    %cst_24 = arith.constant dense<0.000000e+00> : vector<128xf32>
    %39 = vector.multi_reduction <add>, %38, %cst_24 [0] : vector<8x128xf32> to vector<128xf32>
    %40 = vector.shape_cast %39 : vector<128xf32> to vector<1x128xf32>
    %cst_25 = arith.constant 1.250000e-01 : f32
    %41 = vector.broadcast %cst_25 : f32 to vector<1x128xf32>
    %42 = arith.mulf %40, %41 : vector<1x128xf32>
    %43 = arith.mulf %38, %38 : vector<8x128xf32>
    %cst_26 = arith.constant dense<0.000000e+00> : vector<128xf32>
    %44 = vector.multi_reduction <add>, %43, %cst_26 [0] : vector<8x128xf32> to vector<128xf32>
    %45 = vector.shape_cast %44 : vector<128xf32> to vector<1x128xf32>
    %cst_27 = arith.constant 1.250000e-01 : f32
    %46 = vector.broadcast %cst_27 : f32 to vector<1x128xf32>
    %47 = arith.mulf %45, %46 : vector<1x128xf32>
    %48 = arith.mulf %42, %42 : vector<1x128xf32>
    %49 = arith.subf %47, %48 : vector<1x128xf32>
    %c0_28 = arith.constant 0 : index
    %c0_29 = arith.constant 0 : index
    %50 = vector.load %arg8[%c0_28, %c0_29] : memref<1x128xf32, #tpu.memory_space<vmem>>, vector<1x128xf32>
    %cst_30 = arith.constant 8.000000e-01 : f32
    %51 = vector.broadcast %cst_30 : f32 to vector<1x128xf32>
    %52 = arith.addf %49, %51 : vector<1x128xf32>
    %53 = math.rsqrt %52 : vector<1x128xf32>
    %54 = arith.mulf %50, %53 : vector<1x128xf32>
    %c0_31 = arith.constant 0 : index
    %c0_32 = arith.constant 0 : index
    %55 = vector.load %arg9[%c0_31, %c0_32] : memref<1x128xf32, #tpu.memory_space<vmem>>, vector<1x128xf32>
    %56 = arith.mulf %42, %54 : vector<1x128xf32>
    %57 = arith.subf %55, %56 : vector<1x128xf32>
    %58 = vector.broadcast %54 : vector<1x128xf32> to vector<8x128xf32>
    %59 = arith.mulf %38, %58 : vector<8x128xf32>
    %60 = vector.broadcast %57 : vector<1x128xf32> to vector<8x128xf32>
    %61 = arith.addf %59, %60 : vector<8x128xf32>
    %cst_33 = arith.constant 0.000000e+00 : f32
    %62 = vector.broadcast %cst_33 : f32 to vector<8x128xf32>
    %63 = arith.cmpf oge, %61, %62 : vector<8x128xf32>
    %cst_34 = arith.constant 2.500000e-01 : f32
    %64 = vector.broadcast %cst_34 : f32 to vector<8x128xf32>
    %65 = arith.mulf %64, %61 : vector<8x128xf32>
    %66 = arith.select %63, %61, %65 : vector<8x128xi1>, vector<8x128xf32>
    %c0_35 = arith.constant 0 : index
    %c0_36 = arith.constant 0 : index
    %67 = vector.load %arg10[%c0_35, %c0_36] : memref<128x256xf32, #tpu.memory_space<vmem>>, vector<128x256xf32>
    %cst_37 = arith.constant dense<0.000000e+00> : vector<8x256xf32>
    %68 = tpu.matmul %66, %67, %cst_37 {dimension_numbers = #tpu.dot_dimension_numbers<[1], [0], [0], [1], [0, 0, 1, 1], [], []>} : vector<8x128xf32>, vector<128x256xf32>, vector<8x256xf32> -> vector<8x256xf32>
    %cst_38 = arith.constant dense<0.000000e+00> : vector<256xf32>
    %69 = vector.multi_reduction <add>, %68, %cst_38 [0] : vector<8x256xf32> to vector<256xf32>
    %70 = vector.shape_cast %69 : vector<256xf32> to vector<1x256xf32>
    %cst_39 = arith.constant 1.250000e-01 : f32
    %71 = vector.broadcast %cst_39 : f32 to vector<1x256xf32>
    %72 = arith.mulf %70, %71 : vector<1x256xf32>
    %73 = arith.mulf %68, %68 : vector<8x256xf32>
    %cst_40 = arith.constant dense<0.000000e+00> : vector<256xf32>
    %74 = vector.multi_reduction <add>, %73, %cst_40 [0] : vector<8x256xf32> to vector<256xf32>
    %75 = vector.shape_cast %74 : vector<256xf32> to vector<1x256xf32>
    %cst_41 = arith.constant 1.250000e-01 : f32
    %76 = vector.broadcast %cst_41 : f32 to vector<1x256xf32>
    %77 = arith.mulf %75, %76 : vector<1x256xf32>
    %78 = arith.mulf %72, %72 : vector<1x256xf32>
    %79 = arith.subf %77, %78 : vector<1x256xf32>
    %c0_42 = arith.constant 0 : index
    %c0_43 = arith.constant 0 : index
    %80 = vector.load %arg11[%c0_42, %c0_43] : memref<1x256xf32, #tpu.memory_space<vmem>>, vector<1x256xf32>
    %cst_44 = arith.constant 8.000000e-01 : f32
    %81 = vector.broadcast %cst_44 : f32 to vector<1x256xf32>
    %82 = arith.addf %79, %81 : vector<1x256xf32>
    %83 = math.rsqrt %82 : vector<1x256xf32>
    %84 = arith.mulf %80, %83 : vector<1x256xf32>
    %c0_45 = arith.constant 0 : index
    %c0_46 = arith.constant 0 : index
    %85 = vector.load %arg12[%c0_45, %c0_46] : memref<1x256xf32, #tpu.memory_space<vmem>>, vector<1x256xf32>
    %86 = arith.mulf %72, %84 : vector<1x256xf32>
    %87 = arith.subf %85, %86 : vector<1x256xf32>
    %88 = vector.broadcast %84 : vector<1x256xf32> to vector<8x256xf32>
    %89 = arith.mulf %68, %88 : vector<8x256xf32>
    %90 = vector.broadcast %87 : vector<1x256xf32> to vector<8x256xf32>
    %91 = arith.addf %89, %90 : vector<8x256xf32>
    %cst_47 = arith.constant 0.000000e+00 : f32
    %92 = vector.broadcast %cst_47 : f32 to vector<8x256xf32>
    %93 = arith.cmpf oge, %91, %92 : vector<8x256xf32>
    %cst_48 = arith.constant 2.500000e-01 : f32
    %94 = vector.broadcast %cst_48 : f32 to vector<8x256xf32>
    %95 = arith.mulf %94, %91 : vector<8x256xf32>
    %96 = arith.select %93, %91, %95 : vector<8x256xi1>, vector<8x256xf32>
    %c0_49 = arith.constant 0 : index
    %c0_50 = arith.constant 0 : index
    %97 = vector.load %arg13[%c0_49, %c0_50] : memref<256x128xf32, #tpu.memory_space<vmem>>, vector<256x128xf32>
    %cst_51 = arith.constant dense<0.000000e+00> : vector<8x128xf32>
    %98 = tpu.matmul %96, %97, %cst_51 {dimension_numbers = #tpu.dot_dimension_numbers<[1], [0], [0], [1], [0, 0, 1, 1], [], []>} : vector<8x256xf32>, vector<256x128xf32>, vector<8x128xf32> -> vector<8x128xf32>
    %c0_52 = arith.constant 0 : index
    %c0_53 = arith.constant 0 : index
    %c0_54 = arith.constant 0 : index
    %99 = vector.load %arg14[%c0_52, %c0_53, %c0_54] : memref<1x8x128xf32, #tpu.memory_space<vmem>>, vector<1x8x128xf32>
    %100 = vector.shape_cast %99 : vector<1x8x128xf32> to vector<8x128xf32>
    %101 = vector.shape_cast %98 : vector<8x128xf32> to vector<1x8x128xf32>
    tpu.vector_store %arg14[%c0_52, %c0_53, %c0_54], %101 {strides = array<i32>} : memref<1x8x128xf32, #tpu.memory_space<vmem>>, vector<1x8x128xf32>,
    return
  }
  func.func @transform_0(%arg0: i32) -> (i32, i32, i32) {
    %c0_i32 = arith.constant 0 : i32
    %c0_i32_0 = arith.constant 0 : i32
    %c0_i32_1 = arith.constant 0 : i32
    return %arg0, %c0_i32, %c0_i32_0 : i32, i32, i32
  }
  func.func @transform_1(%arg0: i32) -> (i32, i32, i32) {
    %c0_i32 = arith.constant 0 : i32
    %c0_i32_0 = arith.constant 0 : i32
    %c0_i32_1 = arith.constant 0 : i32
    return %arg0, %c0_i32, %c0_i32_0 : i32, i32, i32
  }
  func.func @transform_2(%arg0: i32) -> (i32, i32) {
    %c0_i32 = arith.constant 0 : i32
    %c0_i32_0 = arith.constant 0 : i32
    %c0_i32_1 = arith.constant 0 : i32
    return %c0_i32, %c0_i32_0 : i32, i32
  }
  func.func @transform_3(%arg0: i32) -> (i32, i32) {
    %c0_i32 = arith.constant 0 : i32
    %c0_i32_0 = arith.constant 0 : i32
    %c0_i32_1 = arith.constant 0 : i32
    return %c0_i32, %c0_i32_0 : i32, i32
  }
  func.func @transform_4(%arg0: i32) -> (i32, i32) {
    %c0_i32 = arith.constant 0 : i32
    %c0_i32_0 = arith.constant 0 : i32
    %c0_i32_1 = arith.constant 0 : i32
    return %c0_i32, %c0_i32_0 : i32, i32
  }
  func.func @transform_5(%arg0: i32) -> (i32, i32) {
    %c0_i32 = arith.constant 0 : i32
    %c0_i32_0 = arith.constant 0 : i32
    %c0_i32_1 = arith.constant 0 : i32
    return %c0_i32, %c0_i32_0 : i32, i32
  }
  func.func @transform_6(%arg0: i32) -> (i32, i32) {
    %c0_i32 = arith.constant 0 : i32
    %c0_i32_0 = arith.constant 0 : i32
    %c0_i32_1 = arith.constant 0 : i32
    return %c0_i32, %c0_i32_0 : i32, i32
  }
  func.func @transform_7(%arg0: i32) -> (i32, i32) {
    %c0_i32 = arith.constant 0 : i32
    %c0_i32_0 = arith.constant 0 : i32
    %c0_i32_1 = arith.constant 0 : i32
    return %c0_i32, %c0_i32_0 : i32, i32
  }
  func.func @transform_8(%arg0: i32) -> (i32, i32) {
    %c0_i32 = arith.constant 0 : i32
    %c0_i32_0 = arith.constant 0 : i32
    %c0_i32_1 = arith.constant 0 : i32
    return %c0_i32, %c0_i32_0 : i32, i32
  }
  func.func @transform_9(%arg0: i32) -> (i32, i32) {
    %c0_i32 = arith.constant 0 : i32
    %c0_i32_0 = arith.constant 0 : i32
    %c0_i32_1 = arith.constant 0 : i32
    return %c0_i32, %c0_i32_0 : i32, i32
  }
  func.func @transform_10(%arg0: i32) -> (i32, i32) {
    %c0_i32 = arith.constant 0 : i32
    %c0_i32_0 = arith.constant 0 : i32
    %c0_i32_1 = arith.constant 0 : i32
    return %c0_i32, %c0_i32_0 : i32, i32
  }
  func.func @transform_11(%arg0: i32) -> (i32, i32) {
    %c0_i32 = arith.constant 0 : i32
    %c0_i32_0 = arith.constant 0 : i32
    %c0_i32_1 = arith.constant 0 : i32
    return %c0_i32, %c0_i32_0 : i32, i32
  }
  func.func @transform_12(%arg0: i32) -> (i32, i32) {
    %c0_i32 = arith.constant 0 : i32
    %c0_i32_0 = arith.constant 0 : i32
    %c0_i32_1 = arith.constant 0 : i32
    return %c0_i32, %c0_i32_0 : i32, i32
  }
  func.func @transform_13(%arg0: i32) -> (i32, i32, i32) {
    %c0_i32 = arith.constant 0 : i32
    %c0_i32_0 = arith.constant 0 : i32
    %c0_i32_1 = arith.constant 0 : i32
    return %arg0, %c0_i32, %c0_i32_0 : i32, i32, i32
  }
}

</mosaic_0001>

<bundles_post_ra>
// kernel: tpu_custom_call.1
= control target key start
LH: loop header
LB: loop body
LE: loop exit
PB: predicated region body
PF: predicated region fallthrough
CT: control target
= control target key end

     0   :  { %s2235_s0 = inlined_call_operand.hbm [shape: f32[4,8,32], index: 0, kind: input, shape index: {}]   ;;  %s2236_s1 = inlined_call_operand.hbm [shape: f32[4,8,32], index: 1, kind: input, shape index: {}]   ;;  %s2237_s2 = inlined_call_operand.hbm [shape: f32[32,256], index: 2, kind: input, shape index: {}]   ;;  %s2238_s3 = inlined_call_operand.hbm [shape: f32[32,256], index: 3, kind: input, shape index: {}]   ;;  %s2239_s4 = inlined_call_operand.vmem [shape: f32[1,256], index: 4, kind: input, shape index: {}]   ;;  %s2240_s5 = inlined_call_operand.vmem [shape: f32[1,256], index: 5, kind: input, shape index: {}]   ;;  %s2241_s6 = inlined_call_operand.hbm [shape: f32[256,128], index: 6, kind: input, shape index: {}]   ;;  %s2242_s7 = inlined_call_operand.hbm [shape: f32[1,128], index: 7, kind: input, shape index: {}]   ;;  %s2243_s8 = inlined_call_operand.hbm [shape: f32[1,128], index: 8, kind: input, shape index: {}]   ;;  %s2244_s9 = inlined_call_operand.hbm [shape: f32[128,256], index: 9, kind: input, shape index: {}]   ;;  %s2245_s10 = inlined_call_operand.vmem [shape: f32[1,256], index: 10, kind: input, shape index: {}]   ;;  %s2246_s11 = inlined_call_operand.vmem [shape: f32[1,256], index: 11, kind: input, shape index: {}]   ;;  %s2247_s12 = inlined_call_operand.hbm [shape: f32[256,128], index: 12, kind: input, shape index: {}]   ;;  %s2248_s13 = inlined_call_operand.hbm [shape: f32[4,8,128], index: 13, kind: output, shape index: {}]  }
   0x1   :  { %2251 = sst [smem:[#allocation27_spill]] %s2237_s2 }
   0x2   :  { %2252 = sst [smem:[#allocation28_spill]] %s2238_s3 }
   0x3   :  { %2253 = sst [smem:[#allocation29_spill]] %s2241_s6 }
   0x4   :  { %2254 = sst [smem:[#allocation30_spill]] %s2242_s7 }
   0x5   :  { %2255 = sst [smem:[#allocation31_spill]] %s2243_s8 }
   0x6   :  { %2256 = sst [smem:[#allocation32_spill]] %s2244_s9 }
   0x7   :  { %2257 = sst [smem:[#allocation33_spill]] %s2245_s10 }
   0x8   :  { %2258 = sst [smem:[#allocation34_spill]] %s2246_s11 }
   0x9   :  { %2259 = sst [smem:[#allocation35_spill]] %s2247_s12 }
   0xa   :  { %2260 = sst [smem:[#allocation36_spill]] %s2248_s13 }
   0xb   :  { %18 = vsyncpa [#allocation3], 0 }
   0xc   :  { %20 = vsyncpa [#allocation3 + $0x1], 0 }
   0xd   :  { %21 = vsyncpa [#allocation6], 0 }
   0xe   :  { %23 = vsyncpa [#allocation6 + $0x1], 0 }
   0xf   :  { %24 = vsyncpa [#allocation9], 0 }
  0x10   :  { %25 = vsyncpa [#allocation12], 0 }
  0x11   :  { %26 = vsyncpa [#allocation15], 0 }
  0x12   :  { %27 = vsyncpa [#allocation4], 0 }
  0x13   :  { %29 = vsyncpa [#allocation4 + $0x1], 0  ;;  %s1942_s25 = smov 0   ;;  %s1944_s26 = smov 0  }
  0x14   :  { %s1946_s27 = smov 0   ;;  %s1948_s28 = smov 0  }
  0x15 LB: > { %2261 = sst [smem:[#allocation25_spill]] %s1855_s27  ;;  %s1966_s15 = sadd.s32 4294967295, %s1859_s28   ;;  %s1859_s28 = sphi %s1948_s28, %s2284_s28   ;;  %s1855_s27 = sphi %s1946_s27, %s2281_s27   ;;  %s1851_s26 = sphi %s1944_s26, %s2283_s26   ;;  %s1847_s25 = sphi %s1942_s25, %s2282_s25  }
  0x16   : > { %s2262_s2 = sld [smem:[#allocation27_spill]]  ;;  %p1335_p0 = scmp.ge.s32.totalorder %s1859_s28, 1 }
  0x17   : > { %p56_p1 = scmp.eq.s32.totalorder %s1966_s15, 0  ;;  %p349_p2 = scmp.lt.s32.totalorder %s1859_s28, 5 }
  0x18   : > { %s1861_s17 = smov [#allocation7]   ;;  %s2264_s3 = sld [smem:[#allocation28_spill]] }
  0x19   : > { %p1971_p3 = pnand %p1335_p0, %p349_p2  ;;  %s362_s18 = sshll.u32 %s1861_s17, 4  ;;  %s363_s18 = int_to_ptr.vmem [resolvable:$true] %s362_s18 }
  0x1a   : > { %s2266_s7 = sld [smem:[#allocation30_spill]]  ;;  %s1862_s30 = smov [#allocation8]  }
  0x1b   : > { %p1401_p4 = pneg %p1971_p3  ;;  %s376_s17 = sshll.u32 %s1862_s30, 4  ;;  %s377_s17 = int_to_ptr.vmem [resolvable:$true] %s376_s17 }
  0x1c   : > { %s360_s14 = sshll.u32 %s2262_s2, 4  ;;  %s1863_s2 = smov 256   ;;  %s361_s14 = int_to_ptr.hbm [resolvable:$true] %s360_s14 }
  0x1d   : > { %p1982_p5 = pnand %p1401_p4, %p56_p1  ;;  %s1864_s13 = smov 16  }
  0x1e   : > { %s374_s21 = sshll.u32 %s2264_s3, 4  ;;  %s2267_s9 = sld [smem:[#allocation32_spill]]  ;;  %s375_s21 = int_to_ptr.hbm [resolvable:$true] %s374_s21 }
  0x1f   : > { %1404 = dma.hbm_to_vmem [thread:$0]  (!%p1982_p5), %s361_s14, 1024, %s363_s18, [#allocation6], %s1863_s2, %s1863_s2, %s1864_s13  }
  0x20   : > { %s409_s29 = sshll.u32 %s2266_s7, 4  ;;  %s1865_s11 = smov [#allocation11]   ;;  %s410_s29 = int_to_ptr.hbm [resolvable:$true] %s409_s29 }
  0x21   : > { %1407 = dma.hbm_to_vmem [thread:$0]  (!%p1982_p5), %s375_s21, 1024, %s377_s17, [#allocation9], %s1863_s2, %s1863_s2, %s1864_s13  }
  0x22   : > { %s411_s10 = sshll.u32 %s1865_s11, 4  ;;  %s1866_s23 = smov [#allocation14]   ;;  %s412_s10 = int_to_ptr.vmem [resolvable:$true] %s411_s10 }
  0x23   : > { %1413 = dma.hbm_to_vmem [thread:$0]  (!%p1982_p5), %s410_s29, 16, %s412_s10, [#allocation12]  }
  0x24   : > { %s432_s3 = sshll.u32 %s2267_s9, 4  ;;  %s434_s24 = sshll.u32 %s1866_s23, 4  ;;  %s433_s3 = int_to_ptr.hbm [resolvable:$true] %s432_s3  ;;  %s435_s24 = int_to_ptr.vmem [resolvable:$true] %s434_s24 }
  0x25   : > { %s2268_s6 = sld [smem:[#allocation29_spill]]  ;;  %s1867_s18 = smov [#allocation10]  }
  0x26   : > { %1419 = dma.hbm_to_vmem [thread:$0]  (!%p1982_p5), %s433_s3, 4096, %s435_s24, [#allocation15], %s1863_s2, %s1863_s2, %s1864_s13  }
  0x27   : > { %s396_s21 = sshll.u32 %s1867_s18, 4  ;;  %s2269_s8 = sld [smem:[#allocation31_spill]]  ;;  %s397_s21 = int_to_ptr.vmem [resolvable:$true] %s396_s21 }
  0x28   : > { %s1868_s29 = smov 128   ;;  %s1869_s19 = smov 8  }
  0x29   : > { %s1870_s2 = smov [#allocation13]   ;;  %s2270_s12 = sld [smem:[#allocation35_spill]] }
  0x2a   : > { %s423_s3 = sshll.u32 %s1870_s2, 4  ;;  %s1871_s23 = smov [#allocation16]   ;;  %s424_s3 = int_to_ptr.vmem [resolvable:$true] %s423_s3 }
  0x2b   : > { %s394_s14 = sshll.u32 %s2268_s6, 4  ;;  %s454_s24 = sshll.u32 %s1871_s23, 4  ;;  %s395_s14 = int_to_ptr.hbm [resolvable:$true] %s394_s14  ;;  %s455_s24 = int_to_ptr.vmem [resolvable:$true] %s454_s24 }
  0x2c   : > { %1410 = dma.hbm_to_vmem [thread:$0]  (!%p1982_p5), %s395_s14, 4096, %s397_s21, [#allocation9], %s1868_s29, %s1868_s29, %s1869_s19  }
  0x2d   : > { %s421_s10 = sshll.u32 %s2269_s8, 4  ;;  %s1334_s30 = sadd.s32 4294967294, %s1859_s28   ;;  %s422_s10 = int_to_ptr.hbm [resolvable:$true] %s421_s10 }
  0x2e   : > { %1416 = dma.hbm_to_vmem [thread:$0]  (!%p1982_p5), %s422_s10, 16, %s424_s3, [#allocation12]  }
  0x2f   : > { %s452_s20 = sshll.u32 %s2270_s12, 4  ;;  %s2017_s14 = sadd.s32 1, %s1859_s28   ;;  %s453_s20 = int_to_ptr.hbm [resolvable:$true] %s452_s20 }
  0x30   : > { %1422 = dma.hbm_to_vmem [thread:$0]  (!%p1982_p5), %s453_s20, 4096, %s455_s24, [#allocation15], %s1868_s29, %s1868_s29, %s1869_s19  }
  0x31   : > { %s42_s18 = sadd.s32 1, %s1855_s27  ;;  %s39_s21 = ssub.s32 %s1859_s28, %s2017_s14 }
  0x32   : > { %p49_p6 = scmp.ne.s32.totalorder %s1855_s27, %s1851_s26  ;;  %p40_p7 = scmp.eq.s32.totalorder %s39_s21, 0 }
  0x33   : > { %p50_p8 = scmp.eq.s32.totalorder %s1859_s28, 0  ;;  %p55_p9 = scmp.ne.s32.totalorder %s1851_s26, %s1847_s25 }
  0x34   : > { %p336_p10 = scmp.eq.s32.totalorder %s1966_s15, 3  ;;  %p342_p0 = scmp.eq.s32.totalorder %s1334_s30, 3 }
  0x35   : > { %s2029_s11 = scalar_select %p40_p7, %s1855_s27, %s42_s18  }
  0x36   : > { %p2031_p11 = por %p50_p8, %p49_p6  ;;  %p2037_p12 = por %p56_p1, %p55_p9 }
  0x37   : > { %2271 = sst [smem:[#allocation26_spill]] %s2029_s11  ;;  %p2041_p13 = por %p336_p10, %p49_p6 }
  0x38   : > { %p1441_p2 = scmp.lt.s32.totalorder %s1859_s28, 4  ;;  %s468_s29 = sand.u32 1, %s1855_s27  }
  0x39   : > { %p2047_p4 = por %p342_p0, %p55_p9  ;;  %s1344_s2 = sshll.u32 %s468_s29, 3 }
  0x3a   : > { %s1345_s3 = sshll.u32 %s1859_s28, 3  ;;  %s472_s24 = scalar_lea.vmem [#allocation2], %s1344_s2 }
  0x3b   : > { %s476_s20 = scalar_lea.hbm %s2235_s0, %s1345_s3  ;;  %s480_s18 = sshll.u32 %s472_s24, 4  ;;  %s481_s18 = int_to_ptr.vmem [resolvable:$true] %s480_s18 }
  0x3c   : > { %s478_s23 = sshll.u32 %s476_s20, 4  ;;  %p2057_p5 = pnand %p1441_p2, %p2031_p11  ;;  %s479_s23 = int_to_ptr.hbm [resolvable:$true] %s478_s23 }
  0x3d   : > { %s495_s8 = scalar_lea.hbm %s2236_s1, %s1345_s3  ;;  %s487_s9 = sand.u32 1, %s1859_s28  }
  0x3e   : > { %s469_s12 = scalar_lea.sflag [#allocation3], %s468_s29  ;;  %s1713_s7 = sshra.s32 %s479_s23, 4  ;;  %s1714_s7 = int_to_ptr.hbm [resolvable:$true] %s1713_s7 }
  0x3f   : > { %s1715_s13 = scalar_lea.hbm %s1714_s7, 8  ;;  %p1717_p7 = pneg %p2057_p5 }
  0x40   : > { %p1716_p6 = scmp.ne.s32.totalorder %s1714_s7, %s1715_s13  ;;  %s1720_s24 = scalar_lea.hbm %s2235_s0, 32 }
  0x41   : > { %p1721_p10 = scmp.lt.s32.totalorder %s1714_s7, %s2235_s0  ;;  %p1722_p11 = scmp.lt.s32.totalorder %s1720_s24, %s1715_s13 }
  0x42   : > { %p1718_p8 = pnand %p1717_p7, %p1716_p6 }
  0x43   : > { %p1723_p0 = por %p1722_p11, %p1721_p10 }
  0x44   : > { %p1719_p9 = pneg %p1718_p8 }
  0x46   : > { %p1724_p2 = pnand %p1723_p0, %p1719_p9 }
  0x48   : > { %1727 = shalt.err (!%p1724_p2)
}
  0x49   : > { %1426 = dma.hbm_to_vmem [thread:$0]  (!%p2057_p5), %s479_s23, 128, %s481_s18, %s469_s12  }
  0x4a   : > { %s497_s29 = sshll.u32 %s495_s8, 4  ;;  %s491_s3 = scalar_lea.vmem [#allocation5], %s1344_s2  ;;  %s498_s29 = int_to_ptr.hbm [resolvable:$true] %s497_s29 }
  0x4b   : > { %s499_s11 = sshll.u32 %s491_s3, 4  ;;  %s488_s27 = scalar_lea.sflag [#allocation6], %s487_s9  ;;  %s500_s11 = int_to_ptr.vmem [resolvable:$true] %s499_s11 }
  0x4c   : > { %s1743_s17 = sshra.s32 %s498_s29, 4  ;;  %s1750_s24 = scalar_lea.hbm %s2236_s1, 32  ;;  %s1744_s17 = int_to_ptr.hbm [resolvable:$true] %s1743_s17 }
  0x4d   : > { %s1745_s20 = scalar_lea.hbm %s1744_s17, 8  ;;  %p1751_p9 = scmp.lt.s32.totalorder %s1744_s17, %s2236_s1 }
  0x4e   : > { %p1746_p6 = scmp.ne.s32.totalorder %s1744_s17, %s1745_s20  ;;  %p1752_p11 = scmp.lt.s32.totalorder %s1750_s24, %s1745_s20 }
  0x50   : > { %p1748_p8 = pnand %p1746_p6, %p1717_p7  ;;  %p1753_p0 = por %p1752_p11, %p1751_p9 }
  0x52   : > { %p1749_p10 = pneg %p1748_p8 }
  0x54   : > { %p1754_p2 = pnand %p1753_p0, %p1749_p10 }
  0x56   : > { %1757 = shalt.err (!%p1754_p2)
}
  0x57   : > { %1429 = dma.hbm_to_vmem [thread:$0]  (!%p2057_p5), %s498_s29, 128, %s500_s11, %s488_s27  }
  0x58   : > { %508 = sbr.rel (%p1971_p3) target bundleno = 816 (0x330), region = 72  ;;  %s2092_s8 = sand.u32 (!%p1971_p3), 1, %s1851_s26  }
  0x59   : > { %s2095_s9 = sshll.u32 (!%p1971_p3), %s2092_s8, 3  ;;  %s511_s2 = scalar_lea.sflag (!%p1971_p3), [#allocation3], %s2092_s8 }
  0x5a   : > { %s514_s23 = scalar_lea.vmem (!%p1971_p3), [#allocation2], %s2095_s9 }
  0x5d   : > { %1818 = dma.done.wait (%p2037_p12), %s511_s2, 128  }
  0x5e   : > { %1820 = vsyncadd (%p2037_p12), %s511_s2, 4294967168  ;;  %s520_s27 = sand.u32 1, %s1966_s15   ;;  %s524_s11 = scalar_lea.vmem [#allocation5], %s2095_s9 }
  0x5f   : > { %s521_s16 = scalar_lea.sflag [#allocation6], %s520_s27 }
  0x60   : > { %1822 = dma.done.wait (%p2037_p12), %s521_s16, 128  }
  0x61   : > { %1824 = vsyncadd (%p2037_p12), %s521_s16, 4294967168 }
  0x62   : > { %1826 = dma.done.wait (%p56_p1), [#allocation6], 1024  }
  0x63   : > { %1828 = vsyncadd (%p56_p1), [#allocation6], 4294966272 }
  0x64   : > { %1830 = dma.done.wait (%p56_p1), [#allocation9], 5120  }
  0x65   : > { %1832 = vsyncadd (%p56_p1), [#allocation9], 4294962176 }
  0x66   : > { %1834 = dma.done.wait (%p56_p1), [#allocation12], 32  }
  0x67   : > { %1836 = vsyncadd (%p56_p1), [#allocation12], 4294967264 }
  0x68   : > { %1838 = dma.done.wait (%p56_p1), [#allocation15], 8192  }
  0x69   : > { %1840 = vsyncadd (%p56_p1), [#allocation15], 4294959104  ;;  %v624_v0 = vld [vmem:[#allocation8 + $0x30] sm:$0xff]  ;;  %v625_v1 = vld [vmem:[#allocation8 + $0x38] sm:$0xff]  ;;  %vm626_vm0 = vcmask 261120   ;;  %vm773_vm6 = vcmask 1040384  }
  0x6a   : > { %v622_v2 = vld [vmem:[#allocation8 + $0x20] sm:$0xff]  ;;  %642 = vmatpush.msra.mxu2 %v624_v0  ;;  %662 = vmatpush.msra.mxu3 %v625_v1  ;;  %v623_v3 = vld [vmem:[#allocation8 + $0x28] sm:$0xff]  ;;  %v620_v4 = vld [vmem:[#allocation8 + $0x10] sm:$0xff]  ;;  %s2277_s17 = sld [smem:[#allocation33_spill]]  ;;  %s1364_s24 = sshll.u32 %s1966_s15, 3 }
  0x6b   : > { %v621_v5 = vld [vmem:[#allocation8 + $0x18] sm:$0xff]  ;;  %v618_v6 = vld [vmem:[#allocation8] sm:$0xff]  ;;  %v619_v7 = vld [vmem:[#allocation8 + $0x8] sm:$0xff]  ;;  %s2278_s13 = sld [smem:[#allocation34_spill]]  ;;  %s607_s27 = scalar_lea.vmem [#allocation17], %s2095_s9 }
  0x6c   : > { %643 = vmatpush.msra.mxu2 %v622_v2  ;;  %663 = vmatpush.msra.mxu3 %v623_v3  ;;  %v609_v8 = vld [vmem:[%s524_s11] sm:$0xff]  ;;  %v615_v11 = vld [vmem:[#allocation7 + $0x28] sm:$0xff]  ;;  %v614_v12 = vld [vmem:[#allocation7 + $0x20] sm:$0xff]  ;;  %s2279_s2 = sld [smem:[#allocation36_spill]]  ;;  %s1172_s16 = sshll.u32 %s607_s27, 4  ;;  %s1173_s16 = int_to_ptr.vmem [resolvable:$true] %s1172_s16 }
  0x6d   : > { %v617_v9 = vld [vmem:[#allocation7 + $0x38] sm:$0xff]  ;;  %v616_v10 = vld [vmem:[#allocation7 + $0x30] sm:$0xff]  ;;  %v611_v15 = vld [vmem:[#allocation7 + $0x8] sm:$0xff]  ;;  %s1160_s22 = scalar_lea.sflag [#allocation4], %s2092_s8 }
  0x6e   : > { %644 = vmatpush.msra.mxu2 %v620_v4  ;;  %664 = vmatpush.msra.mxu3 %v621_v5  ;;  %v613_v13 = vld [vmem:[#allocation7 + $0x18] sm:$0xff]  ;;  %v612_v14 = vld [vmem:[#allocation7 + $0x10] sm:$0xff]  ;;  %v610_v16 = vld [vmem:[#allocation7] sm:$0xff] }
  0x6f   : > { %v608_v17 = vld [vmem:[%s514_s23] sm:$0xff]  ;;  %v821_v20 = vld [vmem:[#allocation10 + $0x78] sm:$0xff]  ;;  %v820_v24 = vld [vmem:[#allocation10 + $0x70] sm:$0xff] }
  0x70   : > { %645 = vmatpush.msra.mxu2 %v618_v6  ;;  %665 = vmatpush.msra.mxu3 %v619_v7  ;;  %v837_v21 = vld [vmem:[#allocation10 + $0xf8] sm:$0xff]  ;;  %v836_v25 = vld [vmem:[#allocation10 + $0xf0] sm:$0xff]  ;;  %v819_v26 = vld [vmem:[#allocation10 + $0x68] sm:$0xff] }
  0x71   : > { %1359 = vmatmul.msk.f32.vlgmr.msra.gmra.mxu2 %vm626_vm0, %v609_v8  ;;  %1360 = vmatmul.msk.f32.vlgmr.msra.gmra.mxu3 %vm626_vm0, %v609_v8  ;;  %v835_v29 = vld [vmem:[#allocation10 + $0xe8] sm:$0xff]  ;;  %v818_v30 = vld [vmem:[#allocation10 + $0x60] sm:$0xff]  ;;  %v817_v36 = vld [vmem:[#allocation10 + $0x58] sm:$0xff] }
  0x72   : > { %705 = vmatpush.msrb.mxu3 %v617_v9  ;;  %685 = vmatpush.msrb.mxu2 %v616_v10  ;;  %v834_v31 = vld [vmem:[#allocation10 + $0xe0] sm:$0xff]  ;;  %v833_v37 = vld [vmem:[#allocation10 + $0xd8] sm:$0xff]  ;;  %v816_v42 = vld [vmem:[#allocation10 + $0x50] sm:$0xff]  ;;  %s1170_s23 = scalar_lea.hbm %s2279_s2, %s1364_s24  ;;  %s1793_s9 = scalar_lea.hbm %s2279_s2, 32 }
  0x73   : > { %838 = vmatpush.msra.mxu0 %v821_v20  ;;  %858 = vmatpush.msra.mxu1 %v837_v21  ;;  %v832_v43 = vld [vmem:[#allocation10 + $0xd0] sm:$0xff]  ;;  %v815_v48 = vld [vmem:[#allocation10 + $0x48] sm:$0xff]  ;;  %v814_v54 = vld [vmem:[#allocation10 + $0x40] sm:$0xff]  ;;  %s1174_s11 = sshll.u32 %s1170_s23, 4  ;;  %s1175_s11 = int_to_ptr.hbm [resolvable:$true] %s1174_s11 }
  0x74   : > { %706 = vmatpush.msrb.mxu3 %v615_v11  ;;  %686 = vmatpush.msrb.mxu2 %v614_v12  ;;  %v831_v49 = vld [vmem:[#allocation10 + $0xc8] sm:$0xff]  ;;  %v830_v55 = vld [vmem:[#allocation10 + $0xc0] sm:$0xff]  ;;  %v813_v60 = vld [vmem:[#allocation10 + $0x38] sm:$0xff]  ;;  %s1787_s18 = sshra.s32 %s1175_s11, 4  ;;  %s1788_s18 = int_to_ptr.hbm [resolvable:$true] %s1787_s18 }
  0x75   : > { %839 = vmatpush.msra.mxu0 %v820_v24  ;;  %859 = vmatpush.msra.mxu1 %v836_v25  ;;  %v829_v61 = vld [vmem:[#allocation10 + $0xb8] sm:$0xff]  ;;  %v812_v2 = vld [vmem:[#allocation10 + $0x30] sm:$0xff]  ;;  %v811_v8 = vld [vmem:[#allocation10 + $0x28] sm:$0xff]  ;;  %s1789_s30 = scalar_lea.hbm %s1788_s18, 8  ;;  %p1794_p5 = scmp.lt.s32.totalorder %s1788_s18, %s2279_s2 }
  0x76   : > { %707 = vmatpush.msrb.mxu3 %v613_v13  ;;  %687 = vmatpush.msrb.mxu2 %v612_v14  ;;  %v828_v3 = vld [vmem:[#allocation10 + $0xb0] sm:$0xff]  ;;  %v827_v9 = vld [vmem:[#allocation10 + $0xa8] sm:$0xff]  ;;  %v810_v14 = vld [vmem:[#allocation10 + $0x20] sm:$0xff]  ;;  %p1790_p1 = scmp.ne.s32.totalorder %s1788_s18, %s1789_s30  ;;  %p1795_p7 = scmp.lt.s32.totalorder %s1793_s9, %s1789_s30 }
  0x77   : > { %840 = vmatpush.msra.mxu0 %v819_v26  ;;  %860 = vmatpush.msra.mxu1 %v835_v29  ;;  %v807_v24 = vld [vmem:[#allocation10 + $0x8] sm:$0xff]  ;;  %v806_v26 = vld [vmem:[#allocation10] sm:$0xff] }
  0x78   : > { %708 = vmatpush.msrb.mxu3 %v611_v15  ;;  %688 = vmatpush.msrb.mxu2 %v610_v16  ;;  %v826_v15 = vld [vmem:[#allocation10 + $0xa0] sm:$0xff]  ;;  %v823_v25 = vld [vmem:[#allocation10 + $0x88] sm:$0xff]  ;;  %p1791_p3 = pnand %p1790_p1, %p2041_p13  ;;  %p1796_p6 = por %p1795_p7, %p1794_p5 }
  0x79   : > { %1361 = vmatmul.msk.f32.vlgmr.msrb.gmra.mxu2 %vm626_vm0, %v608_v17  ;;  %1362 = vmatmul.msk.f32.vlgmr.msrb.gmra.mxu3 %vm626_vm0, %v608_v17  ;;  %v822_v29 = vld [vmem:[#allocation10 + $0x80] sm:$0xff] }
  0x7a   : > { %841 = vmatpush.msra.mxu0 %v818_v30  ;;  %861 = vmatpush.msra.mxu1 %v834_v31  ;;  %p1792_p12 = pneg %p1791_p3 }
  0x7c   : > { %842 = vmatpush.msra.mxu0 %v817_v36  ;;  %862 = vmatpush.msra.mxu1 %v833_v37  ;;  %p1797_p8 = pnand %p1796_p6, %p1792_p12 }
  0x7e   : > { %843 = vmatpush.msra.mxu0 %v816_v42  ;;  %863 = vmatpush.msra.mxu1 %v832_v43  ;;  %v747_v43 = vld [vmem:[%s2239_s4] sm:$0x3] }
  0x80   : > { %844 = vmatpush.msra.mxu0 %v815_v48  ;;  %864 = vmatpush.msra.mxu1 %v831_v49 }
  0x82   : > { %845 = vmatpush.msra.mxu0 %v814_v54  ;;  %865 = vmatpush.msra.mxu1 %v830_v55 }
  0x84   : > { %846 = vmatpush.msra.mxu0 %v813_v60  ;;  %866 = vmatpush.msra.mxu1 %v829_v61 }
  0x86   : > { %847 = vmatpush.msra.mxu0 %v812_v2  ;;  %867 = vmatpush.msra.mxu1 %v828_v3  ;;  %v952_v2 = vld [vmem:[#allocation14 + $0xf0] sm:$0xff]  ;;  %v953_v3 = vld [vmem:[#allocation14 + $0xf8] sm:$0xff] }
  0x87   : > { %954 = vmatpush.msra.mxu2 %v952_v2  ;;  %974 = vmatpush.msra.mxu3 %v953_v3 }
  0x88   : > { %848 = vmatpush.msra.mxu0 %v811_v8  ;;  %868 = vmatpush.msra.mxu1 %v827_v9  ;;  %v944_v8 = vld [vmem:[#allocation14 + $0xb0] sm:$0xff]  ;;  %v945_v9 = vld [vmem:[#allocation14 + $0xb8] sm:$0xff] }
  0x8a   : > { %849 = vmatpush.msra.mxu0 %v810_v14  ;;  %869 = vmatpush.msra.mxu1 %v826_v15  ;;  %v943_v14 = vld [vmem:[#allocation14 + $0xa8] sm:$0xff] }
  0xf4   : > { %v647_v18 = vpop.f32.mrf.mxu2  ;;  %v667_v19 = vpop.f32.mrf.mxu3 }
  0xfc   : > { %v690_v22 = vpop.f32.mrf.mxu2  ;;  %v710_v23 = vpop.f32.mrf.mxu3 }
  0xfd   : > { %v2131_v27 = vadd.f32 %v690_v22, %v647_v18  ;;  %v2133_v28 = vadd.f32 %v710_v23, %v667_v19  ;;  %v809_v18 = vld [vmem:[#allocation10 + $0x18] sm:$0xff]  ;;  %v808_v22 = vld [vmem:[#allocation10 + $0x10] sm:$0xff] }
  0xfe   : > { %v825_v19 = vld [vmem:[#allocation10 + $0x98] sm:$0xff]  ;;  %v824_v23 = vld [vmem:[#allocation10 + $0x90] sm:$0xff]  ;;  %850 = vmatpush.msra.mxu0 %v809_v18 }
  0xff   : > { %v713_v32 = vrot.slane %v2131_v27, 4  ;;  %v727_v33 = vmul.f32 %v2131_v27, %v2131_v27  ;;  %v719_v34 = vrot.slane %v2133_v28, 4  ;;  %v728_v35 = vmul.f32 %v2133_v28, %v2133_v28  ;;  %870 = vmatpush.msra.mxu1 %v825_v19  ;;  %v941_v18 = vld [vmem:[#allocation14 + $0x98] sm:$0xff] }
 0x100   : > { %851 = vmatpush.msra.mxu0 %v808_v22  ;;  %v939_v22 = vld [vmem:[#allocation14 + $0x88] sm:$0xff] }
 0x101   : > { %v714_v38 = vadd.f32 %v713_v32, %v2131_v27  ;;  %v729_v39 = vrot.slane %v727_v33, 4  ;;  %v720_v40 = vadd.f32 %v719_v34, %v2133_v28  ;;  %v735_v41 = vrot.slane %v728_v35, 4  ;;  %871 = vmatpush.msra.mxu1 %v824_v23 }
 0x102   : > { %852 = vmatpush.msra.mxu0 %v807_v24 }
 0x103   : > { %v715_v44 = vrot.slane %v714_v38, 2  ;;  %v730_v45 = vadd.f32 %v729_v39, %v727_v33  ;;  %v721_v46 = vrot.slane %v720_v40, 2  ;;  %v736_v47 = vadd.f32 %v735_v41, %v728_v35  ;;  %872 = vmatpush.msra.mxu1 %v823_v25  ;;  %v936_v25 = vld [vmem:[#allocation14 + $0x70] sm:$0xff] }
 0x104   : > { %853 = vmatpush.msra.mxu0 %v806_v26  ;;  %v937_v26 = vld [vmem:[#allocation14 + $0x78] sm:$0xff] }
 0x105   : > { %v716_v50 = vadd.f32 %v715_v44, %v714_v38  ;;  %v731_v51 = vrot.slane %v730_v45, 2  ;;  %v722_v52 = vadd.f32 %v721_v46, %v720_v40  ;;  %v737_v53 = vrot.slane %v736_v47, 2  ;;  %873 = vmatpush.msra.mxu1 %v822_v29 }
 0x107   : > { %v717_v56 = vrot.slane %v716_v50, 1  ;;  %v732_v57 = vadd.f32 %v731_v51, %v730_v45  ;;  %v723_v58 = vrot.slane %v722_v52, 1  ;;  %v738_v59 = vadd.f32 %v737_v53, %v736_v47  ;;  %v777_v51 = vld [vmem:[%s2240_s5] sm:$0x3] }
 0x109   : > { %v718_v62 = vadd.f32 %v717_v56, %v716_v50  ;;  %v733_v63 = vrot.slane %v732_v57, 1  ;;  %v724_v0 = vadd.f32 %v723_v58, %v722_v52  ;;  %v739_v1 = vrot.slane %v738_v59, 1 }
 0x10b   : > { %v734_v4 = vadd.f32 %v733_v63, %v732_v57  ;;  %v2143_v5 = vmul.f32 0.125, %v724_v0  ;;  %v740_v6 = vadd.f32 %v739_v1, %v738_v59  ;;  %v2145_v7 = vmul.f32 0.125, %v718_v62 }
 0x10d   : > { %v741_v10 = vmul.f32 0.125, %v734_v4  ;;  %v742_v11 = vmul.f32 0.125, %v740_v6  ;;  %v744_v12 = vmul.f32 %v2143_v5, %v2143_v5  ;;  %v743_v13 = vmul.f32 %v2145_v7, %v2145_v7  ;;  %v950_v4 = vld [vmem:[#allocation14 + $0xe0] sm:$0xff] }
 0x10e   : > { %955 = vmatpush.msra.mxu2 %v950_v4  ;;  %v946_v6 = vld [vmem:[#allocation14 + $0xc0] sm:$0xff] }
 0x10f   : > { %v746_v16 = vsub.f32 %v742_v11, %v744_v12  ;;  %v745_v17 = vsub.f32 %v741_v10, %v743_v13  ;;  %v942_v13 = vld [vmem:[#allocation14 + $0xa0] sm:$0xff] }
 0x111   : > { %v749_v20 = vadd.f32 0.8, %v746_v16  ;;  %v748_v21 = vadd.f32 0.8, %v745_v17  ;;  %v940_v17 = vld [vmem:[#allocation14 + $0x90] sm:$0xff] }
 0x113   : > { %1493 = vrsqrt.f32 %v749_v20  ;;  %vm766_vm3 = vweird.f32 %v749_v20  ;;  %vm756_vm5 = vweird.f32 %v748_v21 }
 0x114   : > { %1495 = vrsqrt.f32 %v748_v21 }
 0x119   : > { %v1494_v30 = vpop.eup %1493 }
 0x11a   : > { %v1496_v31 = vpop.eup %1495  ;;  %v761_v32 = vmul.f32 %v1494_v30, %v749_v20  ;;  %vm767_vm1 = vweird.f32 %v1494_v30 }
 0x11b   : > { %v751_v33 = vmul.f32 %v1496_v31, %v748_v21  ;;  %vm757_vm2 = vweird.f32 %v1496_v31  ;;  %vm768_vm4 = vmor %vm766_vm3, %vm767_vm1  ;;  %v938_v21 = vld [vmem:[#allocation14 + $0x80] sm:$0xff] }
 0x11c   : > { %v762_v34 = vmul.f32 %v1494_v30, %v761_v32  ;;  %vm758_vm7 = vmor %vm756_vm5, %vm757_vm2  ;;  %v935_v32 = vld [vmem:[#allocation14 + $0x68] sm:$0xff] }
 0x11d   : > { %v752_v35 = vmul.f32 %v1496_v31, %v751_v33 }
 0x11e   : > { %v763_v36 = vmul.f32 0.5, %v762_v34 }
 0x11f   : > { %v753_v37 = vmul.f32 0.5, %v752_v35  ;;  %v932_v35 = vld [vmem:[#allocation14 + $0x50] sm:$0xff] }
 0x120   : > { %v764_v38 = vsub.f32 1.5, %v763_v36  ;;  %v933_v36 = vld [vmem:[#allocation14 + $0x58] sm:$0xff] }
 0x121   : > { %v754_v39 = vsub.f32 1.5, %v753_v37 }
 0x122   : > { %v765_v40 = vmul.f32 %v1494_v30, %v764_v38 }
 0x123   : > { %v755_v41 = vmul.f32 %v1496_v31, %v754_v39  ;;  %v930_v39 = vld [vmem:[#allocation14 + $0x40] sm:$0xff] }
 0x124   : > { %v769_v42 = vsel %vm768_vm4, %v1494_v30, %v765_v40  ;;  %v931_v40 = vld [vmem:[#allocation14 + $0x48] sm:$0xff] }
 0x125   : > { %v772_v44 = vrot.slane %v769_v42, 7  ;;  %v759_v45 = vsel %vm758_vm7, %v1496_v31, %v755_v41  ;;  %v934_v31 = vld [vmem:[#allocation14 + $0x60] sm:$0xff]  ;;  %v928_v41 = vld [vmem:[#allocation14 + $0x30] sm:$0xff]  ;;  %v929_v42 = vld [vmem:[#allocation14 + $0x38] sm:$0xff] }
 0x127   : > { %v774_v46 = vsel %vm773_vm6, %v759_v45, %v772_v44  ;;  %v926_v45 = vld [vmem:[#allocation14 + $0x20] sm:$0xff] }
 0x128   : > { %v776_v47 = vmul.f32 %v774_v46, %v747_v43  ;;  %v927_v46 = vld [vmem:[#allocation14 + $0x28] sm:$0xff] }
 0x12a   : > { %v779_v48 = vperm.slane %v776_v47, 0  ;;  %v780_v49 = vperm.slane %v776_v47, 1 }
 0x12c   : > { %v784_v50 = vmul.f32 %v780_v49, %v2143_v5  ;;  %v783_v52 = vmul.f32 %v779_v48, %v2145_v7  ;;  %v791_v56 = vmul.f32 %v779_v48, %v2131_v27  ;;  %v792_v58 = vmul.f32 %v780_v49, %v2133_v28  ;;  %v951_v27 = vld [vmem:[#allocation14 + $0xe8] sm:$0xff]  ;;  %v948_v28 = vld [vmem:[#allocation14 + $0xd0] sm:$0xff]  ;;  %v949_v5 = vld [vmem:[#allocation14 + $0xd8] sm:$0xff] }
 0x12d   : > { %975 = vmatpush.msra.mxu3 %v951_v27  ;;  %956 = vmatpush.msra.mxu2 %v948_v28  ;;  %v947_v7 = vld [vmem:[#allocation14 + $0xc8] sm:$0xff]  ;;  %v924_v49 = vld [vmem:[#allocation14 + $0x10] sm:$0xff] }
 0x12e   : > { %v787_v53 = vrot.slane %v784_v50, 7  ;;  %v925_v50 = vld [vmem:[#allocation14 + $0x18] sm:$0xff] }
 0x12f   : > { %976 = vmatpush.msra.mxu3 %v949_v5  ;;  %957 = vmatpush.msra.mxu2 %v946_v6 }
 0x130   : > { %v788_v54 = vsel %vm773_vm6, %v783_v52, %v787_v53  ;;  %v922_v52 = vld [vmem:[#allocation14] sm:$0xff]  ;;  %v923_v53 = vld [vmem:[#allocation14 + $0x8] sm:$0xff] }
 0x131   : > { %v790_v55 = vsub.f32 %v777_v51, %v788_v54  ;;  %977 = vmatpush.msra.mxu3 %v947_v7  ;;  %958 = vmatpush.msra.mxu2 %v944_v8  ;;  %v1101_v7 = vld [vmem:[#allocation16 + $0x78] sm:$0xff] }
 0x132   : > { %v1117_v8 = vld [vmem:[#allocation16 + $0xf8] sm:$0xff]  ;;  %1118 = vmatpush.msrb.mxu0 %v1101_v7  ;;  %v1088_v7 = vld [vmem:[#allocation16 + $0x10] sm:$0xff] }
 0x133   : > { %v794_v57 = vperm.slane %v790_v55, 0  ;;  %v795_v59 = vperm.slane %v790_v55, 1  ;;  %978 = vmatpush.msra.mxu3 %v945_v9  ;;  %959 = vmatpush.msra.mxu2 %v942_v13  ;;  %v1100_v9 = vld [vmem:[#allocation16 + $0x70] sm:$0xff] }
 0x134   : > { %1138 = vmatpush.msrb.mxu1 %v1117_v8  ;;  %1119 = vmatpush.msrb.mxu0 %v1100_v9  ;;  %v1104_v8 = vld [vmem:[#allocation16 + $0x90] sm:$0xff]  ;;  %v1087_v9 = vld [vmem:[#allocation16 + $0x8] sm:$0xff] }
 0x135   : > { %v798_v60 = vadd.f32 %v794_v57, %v791_v56  ;;  %v799_v61 = vadd.f32 %v795_v59, %v792_v58  ;;  %979 = vmatpush.msra.mxu3 %v943_v14  ;;  %960 = vmatpush.msra.mxu2 %v940_v17  ;;  %v1099_v17 = vld [vmem:[#allocation16 + $0x68] sm:$0xff] }
 0x136   : > { %1120 = vmatpush.msrb.mxu0 %v1099_v17 }
 0x137   : > { %vm800_vm8 = vcmp.ge.f32.partialorder %v798_v60, 0.0  ;;  %v802_v62 = vmul.f32 0.25, %v798_v60  ;;  %vm801_vm9 = vcmp.ge.f32.partialorder %v799_v61, 0.0  ;;  %v803_v63 = vmul.f32 0.25, %v799_v61  ;;  %980 = vmatpush.msra.mxu3 %v941_v18  ;;  %961 = vmatpush.msra.mxu2 %v938_v21  ;;  %v1115_v18 = vld [vmem:[#allocation16 + $0xe8] sm:$0xff] }
 0x139   : > { %v804_v0 = vsel %vm800_vm8, %v798_v60, %v802_v62  ;;  %v805_v1 = vsel %vm801_vm9, %v799_v61, %v803_v63  ;;  %981 = vmatpush.msra.mxu3 %v939_v22  ;;  %962 = vmatpush.msra.mxu2 %v936_v25  ;;  %v895_v60 = vld [vmem:[#allocation11] sm:$0x1] }
 0x13a   : > { %854 = vmatmul.f32.vlgmr.msra.gmra.mxu0 %v804_v0  ;;  %874 = vmatmul.f32.vlgmr.msra.gmra.mxu1 %v805_v1  ;;  %v908_v0 = vld [vmem:[#allocation13] sm:$0x1] }
 0x13b   : > { %982 = vmatpush.msra.mxu3 %v937_v26  ;;  %963 = vmatpush.msra.mxu2 %v934_v31  ;;  %v1097_v31 = vld [vmem:[#allocation16 + $0x58] sm:$0xff] }
 0x13d   : > { %983 = vmatpush.msra.mxu3 %v935_v32  ;;  %964 = vmatpush.msra.mxu2 %v932_v35  ;;  %v1113_v32 = vld [vmem:[#allocation16 + $0xd8] sm:$0xff] }
 0x13f   : > { %984 = vmatpush.msra.mxu3 %v933_v36  ;;  %965 = vmatpush.msra.mxu2 %v930_v39 }
 0x141   : > { %985 = vmatpush.msra.mxu3 %v931_v40  ;;  %966 = vmatpush.msra.mxu2 %v928_v41 }
 0x143   : > { %986 = vmatpush.msra.mxu3 %v929_v42  ;;  %967 = vmatpush.msra.mxu2 %v926_v45 }
 0x145   : > { %987 = vmatpush.msra.mxu3 %v927_v46  ;;  %968 = vmatpush.msra.mxu2 %v924_v49  ;;  %v1094_v49 = vld [vmem:[#allocation16 + $0x40] sm:$0xff] }
 0x147   : > { %988 = vmatpush.msra.mxu3 %v925_v50  ;;  %969 = vmatpush.msra.mxu2 %v922_v52  ;;  %v1110_v50 = vld [vmem:[#allocation16 + $0xc0] sm:$0xff] }
 0x149   : > { %989 = vmatpush.msra.mxu3 %v923_v53 }
 0x1b7   : > { %v855_v10 = vpop.f32.mrf.mxu0  ;;  %v875_v11 = vpop.f32.mrf.mxu1 }
 0x1b8   : > { %v2163_v12 = vadd.f32 %v875_v11, %v855_v10  ;;  %v1116_v10 = vld [vmem:[#allocation16 + $0xf0] sm:$0xff] }
 0x1b9   : > { %1139 = vmatpush.msrb.mxu1 %v1116_v10  ;;  %v1103_v10 = vld [vmem:[#allocation16 + $0x88] sm:$0xff] }
 0x1ba   : > { %v878_v15 = vrot.slane %v2163_v12, 4  ;;  %v885_v16 = vmul.f32 %v2163_v12, %v2163_v12 }
 0x1bb   : > { %1140 = vmatpush.msrb.mxu1 %v1115_v18 }
 0x1bc   : > { %v879_v19 = vadd.f32 %v878_v15, %v2163_v12  ;;  %v886_v20 = vrot.slane %v885_v16, 4 }
 0x1be   : > { %v880_v23 = vrot.slane %v879_v19, 2  ;;  %v887_v24 = vadd.f32 %v886_v20, %v885_v16 }
 0x1c0   : > { %v881_v29 = vadd.f32 %v880_v23, %v879_v19  ;;  %v888_v30 = vrot.slane %v887_v24, 2  ;;  %v1098_v23 = vld [vmem:[#allocation16 + $0x60] sm:$0xff] }
 0x1c1   : > { %1121 = vmatpush.msrb.mxu0 %v1098_v23 }
 0x1c2   : > { %v882_v33 = vrot.slane %v881_v29, 1  ;;  %v889_v34 = vadd.f32 %v888_v30, %v887_v24  ;;  %v1114_v24 = vld [vmem:[#allocation16 + $0xe0] sm:$0xff] }
 0x1c3   : > { %1141 = vmatpush.msrb.mxu1 %v1114_v24  ;;  %1122 = vmatpush.msrb.mxu0 %v1097_v31 }
 0x1c4   : > { %v883_v37 = vadd.f32 %v882_v33, %v881_v29  ;;  %v890_v38 = vrot.slane %v889_v34, 1 }
 0x1c5   : > { %1142 = vmatpush.msrb.mxu1 %v1113_v32 }
 0x1c6   : > { %v884_v43 = vmul.f32 0.125, %v883_v37  ;;  %v891_v44 = vadd.f32 %v890_v38, %v889_v34  ;;  %v1096_v37 = vld [vmem:[#allocation16 + $0x50] sm:$0xff] }
 0x1c7   : > { %v1112_v38 = vld [vmem:[#allocation16 + $0xd0] sm:$0xff]  ;;  %1123 = vmatpush.msrb.mxu0 %v1096_v37 }
 0x1c8   : > { %v892_v47 = vmul.f32 0.125, %v891_v44  ;;  %v893_v48 = vmul.f32 %v884_v43, %v884_v43  ;;  %1143 = vmatpush.msrb.mxu1 %v1112_v38  ;;  %v1111_v44 = vld [vmem:[#allocation16 + $0xc8] sm:$0xff]  ;;  %v1057_v38 = vld [vmem:[%s2278_s13] sm:$0x3] }
 0x1ca   : > { %v894_v51 = vsub.f32 %v892_v47, %v893_v48  ;;  %1144 = vmatpush.msrb.mxu1 %v1111_v44 }
 0x1cc   : > { %v896_v54 = vadd.f32 0.8, %v894_v51  ;;  %1145 = vmatpush.msrb.mxu1 %v1110_v50 }
 0x1ce   : > { %1497 = vrsqrt.f32 %v896_v54  ;;  %vm903_vm11 = vweird.f32 %v896_v54 }
 0x1d4   : > { %v1498_v55 = vpop.eup %1497 }
 0x1d5   : > { %v898_v56 = vmul.f32 %v1498_v55, %v896_v54  ;;  %vm904_vm10 = vweird.f32 %v1498_v55 }
 0x1d6   : > { %vm905_vm12 = vmor %vm903_vm11, %vm904_vm10 }
 0x1d7   : > { %v899_v57 = vmul.f32 %v1498_v55, %v898_v56  ;;  %v1109_v56 = vld [vmem:[#allocation16 + $0xb8] sm:$0xff] }
 0x1d8   : > { %1146 = vmatpush.msrb.mxu1 %v1109_v56 }
 0x1d9   : > { %v900_v58 = vmul.f32 0.5, %v899_v57 }
 0x1db   : > { %v901_v59 = vsub.f32 1.5, %v900_v58 }
 0x1dd   : > { %v902_v61 = vmul.f32 %v1498_v55, %v901_v59 }
 0x1df   : > { %v906_v62 = vsel %vm905_vm12, %v1498_v55, %v902_v61  ;;  %v1093_v55 = vld [vmem:[#allocation16 + $0x38] sm:$0xff]  ;;  %v1092_v61 = vld [vmem:[#allocation16 + $0x30] sm:$0xff] }
 0x1e0   : > { %v907_v63 = vmul.f32 %v906_v62, %v895_v60  ;;  %v1108_v62 = vld [vmem:[#allocation16 + $0xb0] sm:$0xff] }
 0x1e1   : > { %1147 = vmatpush.msrb.mxu1 %v1108_v62 }
 0x1e2   : > { %v912_v1 = vperm.slane %v907_v63, 0  ;;  %v909_v2 = vmul.f32 %v907_v63, %v884_v43  ;;  %v1095_v43 = vld [vmem:[#allocation16 + $0x48] sm:$0xff] }
 0x1e3   : > { %1124 = vmatpush.msrb.mxu0 %v1095_v43 }
 0x1e4   : > { %v910_v3 = vsub.f32 %v908_v0, %v909_v2  ;;  %v914_v4 = vmul.f32 %v912_v1, %v2163_v12  ;;  %v1091_v1 = vld [vmem:[#allocation16 + $0x28] sm:$0xff] }
 0x1e5   : > { %1125 = vmatpush.msrb.mxu0 %v1094_v49  ;;  %v1107_v2 = vld [vmem:[#allocation16 + $0xa8] sm:$0xff] }
 0x1e6   : > { %v916_v27 = vperm.slane %v910_v3, 0  ;;  %1148 = vmatpush.msrb.mxu1 %v1107_v2 }
 0x1e7   : > { %1126 = vmatpush.msrb.mxu0 %v1093_v55 }
 0x1e8   : > { %v918_v28 = vadd.f32 %v916_v27, %v914_v4  ;;  %v1090_v27 = vld [vmem:[#allocation16 + $0x20] sm:$0xff] }
 0x1e9   : > { %1127 = vmatpush.msrb.mxu0 %v1092_v61 }
 0x1ea   : > { %vm919_vm13 = vcmp.ge.f32.partialorder %v918_v28, 0.0  ;;  %v920_v5 = vmul.f32 0.25, %v918_v28 }
 0x1eb   : > { %1128 = vmatpush.msrb.mxu0 %v1091_v1 }
 0x1ec   : > { %v921_v6 = vsel %vm919_vm13, %v918_v28, %v920_v5  ;;  %v1106_v28 = vld [vmem:[#allocation16 + $0xa0] sm:$0xff]  ;;  %v1089_v5 = vld [vmem:[#allocation16 + $0x18] sm:$0xff] }
 0x1ed   : > { %970 = vmatmul.f32.vlgmr.msra.gmra.mxu2 %v921_v6  ;;  %990 = vmatmul.f32.vlgmr.msra.gmra.mxu3 %v921_v6  ;;  %v1105_v6 = vld [vmem:[#allocation16 + $0x98] sm:$0xff] }
 0x1ee   : > { %1129 = vmatpush.msrb.mxu0 %v1090_v27  ;;  %1149 = vmatpush.msrb.mxu1 %v1106_v28 }
 0x1f0   : > { %1130 = vmatpush.msrb.mxu0 %v1089_v5  ;;  %1150 = vmatpush.msrb.mxu1 %v1105_v6 }
 0x1f2   : > { %1131 = vmatpush.msrb.mxu0 %v1088_v7  ;;  %1151 = vmatpush.msrb.mxu1 %v1104_v8 }
 0x1f4   : > { %1132 = vmatpush.msrb.mxu0 %v1087_v9  ;;  %1152 = vmatpush.msrb.mxu1 %v1103_v10 }
 0x270   : > { %v2170_v11 = vpop.f32.mrf.mxu2  ;;  %v2172_v13 = vpop.f32.mrf.mxu3 }
 0x271   : > { %v994_v12 = vrot.slane %v2170_v11, 4  ;;  %v1008_v14 = vmul.f32 %v2170_v11, %v2170_v11  ;;  %v1000_v15 = vrot.slane %v2172_v13, 4  ;;  %v1009_v16 = vmul.f32 %v2172_v13, %v2172_v13 }
 0x273   : > { %v995_v19 = vadd.f32 %v994_v12, %v2170_v11  ;;  %v1010_v20 = vrot.slane %v1008_v14, 4  ;;  %v1001_v21 = vadd.f32 %v1000_v15, %v2172_v13  ;;  %v1016_v22 = vrot.slane %v1009_v16, 4  ;;  %v1086_v12 = vld [vmem:[#allocation16] sm:$0xff] }
 0x274   : > { %1133 = vmatpush.msrb.mxu0 %v1086_v12 }
 0x275   : > { %v996_v25 = vrot.slane %v995_v19, 2  ;;  %v1011_v26 = vadd.f32 %v1010_v20, %v1008_v14  ;;  %v1002_v29 = vrot.slane %v1001_v21, 2  ;;  %v1017_v30 = vadd.f32 %v1016_v22, %v1009_v16  ;;  %v1102_v14 = vld [vmem:[#allocation16 + $0x80] sm:$0xff] }
 0x276   : > { %1153 = vmatpush.msrb.mxu1 %v1102_v14 }
 0x277   : > { %v997_v33 = vadd.f32 %v996_v25, %v995_v19  ;;  %v1012_v34 = vrot.slane %v1011_v26, 2  ;;  %v1003_v35 = vadd.f32 %v1002_v29, %v1001_v21  ;;  %v1018_v36 = vrot.slane %v1017_v30, 2 }
 0x279   : > { %v998_v39 = vrot.slane %v997_v33, 1  ;;  %v1013_v40 = vadd.f32 %v1012_v34, %v1011_v26  ;;  %v1004_v41 = vrot.slane %v1003_v35, 1  ;;  %v1019_v42 = vadd.f32 %v1018_v36, %v1017_v30  ;;  %v1028_v30 = vld [vmem:[%s2277_s17] sm:$0x3] }
 0x27b   : > { %v999_v45 = vadd.f32 %v998_v39, %v997_v33  ;;  %v1014_v46 = vrot.slane %v1013_v40, 1  ;;  %v1005_v47 = vadd.f32 %v1004_v41, %v1003_v35  ;;  %v1020_v48 = vrot.slane %v1019_v42, 1 }
 0x27d   : > { %v2182_v51 = vmul.f32 0.125, %v999_v45  ;;  %v1015_v52 = vadd.f32 %v1014_v46, %v1013_v40  ;;  %v2184_v53 = vmul.f32 0.125, %v1005_v47  ;;  %v1021_v54 = vadd.f32 %v1020_v48, %v1019_v42 }
 0x27f   : > { %v1022_v57 = vmul.f32 0.125, %v1015_v52  ;;  %v1024_v58 = vmul.f32 %v2182_v51, %v2182_v51  ;;  %v1023_v59 = vmul.f32 0.125, %v1021_v54  ;;  %v1025_v60 = vmul.f32 %v2184_v53, %v2184_v53 }
 0x281   : > { %v1026_v63 = vsub.f32 %v1022_v57, %v1024_v58  ;;  %v1027_v0 = vsub.f32 %v1023_v59, %v1025_v60 }
 0x283   : > { %v1029_v3 = vadd.f32 0.8, %v1026_v63  ;;  %v1030_v4 = vadd.f32 0.8, %v1027_v0 }
 0x285   : > { %1499 = vrsqrt.f32 %v1029_v3  ;;  %vm1047_vm0 = vweird.f32 %v1030_v4  ;;  %vm1037_vm2 = vweird.f32 %v1029_v3 }
 0x286   : > { %1501 = vrsqrt.f32 %v1030_v4 }
 0x28b   : > { %v1500_v15 = vpop.eup %1499 }
 0x28c   : > { %v1502_v16 = vpop.eup %1501  ;;  %v1032_v17 = vmul.f32 %v1500_v15, %v1029_v3  ;;  %vm1038_vm15 = vweird.f32 %v1500_v15 }
 0x28d   : > { %v1042_v18 = vmul.f32 %v1502_v16, %v1030_v4  ;;  %vm1048_vm14 = vweird.f32 %v1502_v16  ;;  %vm1039_vm3 = vmor %vm1037_vm2, %vm1038_vm15 }
 0x28e   : > { %v1033_v19 = vmul.f32 %v1500_v15, %v1032_v17  ;;  %vm1049_vm1 = vmor %vm1047_vm0, %vm1048_vm14 }
 0x28f   : > { %v1043_v20 = vmul.f32 %v1502_v16, %v1042_v18 }
 0x290   : > { %v1034_v21 = vmul.f32 0.5, %v1033_v19 }
 0x291   : > { %v1044_v22 = vmul.f32 0.5, %v1043_v20 }
 0x292   : > { %v1035_v23 = vsub.f32 1.5, %v1034_v21 }
 0x293   : > { %v1045_v24 = vsub.f32 1.5, %v1044_v22 }
 0x294   : > { %v1036_v25 = vmul.f32 %v1500_v15, %v1035_v23 }
 0x295   : > { %v1046_v26 = vmul.f32 %v1502_v16, %v1045_v24 }
 0x296   : > { %v1040_v32 = vsel %vm1039_vm3, %v1500_v15, %v1036_v25 }
 0x297   : > { %v1050_v29 = vsel %vm1049_vm1, %v1502_v16, %v1046_v26 }
 0x298   : > { %v1053_v31 = vrot.slane %v1050_v29, 7 }
 0x29a   : > { %v1054_v33 = vsel %vm773_vm6, %v1040_v32, %v1053_v31 }
 0x29b   : > { %v1056_v34 = vmul.f32 %v1054_v33, %v1028_v30 }
 0x29d   : > { %v1059_v35 = vperm.slane %v1056_v34, 0  ;;  %v1060_v36 = vperm.slane %v1056_v34, 1 }
 0x29f   : > { %v1064_v37 = vmul.f32 %v1060_v36, %v2184_v53  ;;  %v1063_v39 = vmul.f32 %v1059_v35, %v2182_v51  ;;  %v1072_v43 = vmul.f32 %v1060_v36, %v2172_v13  ;;  %v1071_v45 = vmul.f32 %v1059_v35, %v2170_v11 }
 0x2a1   : > { %v1067_v40 = vrot.slane %v1064_v37, 7 }
 0x2a3   : > { %v1068_v41 = vsel %vm773_vm6, %v1063_v39, %v1067_v40 }
 0x2a4   : > { %v1070_v42 = vsub.f32 %v1057_v38, %v1068_v41 }
 0x2a6   : > { %v1075_v44 = vperm.slane %v1070_v42, 1  ;;  %v1074_v46 = vperm.slane %v1070_v42, 0 }
 0x2a8   : > { %v1079_v47 = vadd.f32 %v1075_v44, %v1072_v43  ;;  %v1078_v48 = vadd.f32 %v1074_v46, %v1071_v45 }
 0x2aa   : > { %vm1080_vm4 = vcmp.ge.f32.partialorder %v1078_v48, 0.0  ;;  %v1082_v49 = vmul.f32 0.25, %v1078_v48  ;;  %vm1081_vm5 = vcmp.ge.f32.partialorder %v1079_v47, 0.0  ;;  %v1083_v50 = vmul.f32 0.25, %v1079_v47 }
 0x2ac   : > { %v1084_v51 = vsel %vm1080_vm4, %v1078_v48, %v1082_v49  ;;  %v1085_v52 = vsel %vm1081_vm5, %v1079_v47, %v1083_v50 }
 0x2ad   : > { %1134 = vmatmul.f32.vlgmr.msrb.gmra.mxu0 %v1084_v51  ;;  %1154 = vmatmul.f32.vlgmr.msrb.gmra.mxu1 %v1085_v52 }
 0x32a   : > { %v1135_v11 = vpop.f32.mrf.mxu0  ;;  %v1155_v13 = vpop.f32.mrf.mxu1 }
 0x32b   : > { %v1156_v53 = vadd.f32 %v1155_v13, %v1135_v11 }
 0x32d   : > { %1158 = vst [vmem:[%s607_s27] sm:$0xff] %v1156_v53 }
 0x32e   : > { %1800 = shalt.err (!%p1797_p8)
}
 0x32f   : > { %1399 = dma.vmem_to_hbm [thread:$0]  (%p2041_p13), %s1173_s16, 128, %s1175_s11, %s1160_s22  }
 0x330 PF: > { %p1449_p10 = scmp.ge.s32.totalorder %s1859_s28, 2  ;;  %s1186_s8 = sand.u32 1, %s1847_s25  }
 0x331   : > { %s1187_s17 = scalar_lea.sflag [#allocation4], %s1186_s8 }
 0x332   : > { %p1431_p9 = pnand %p1449_p10, %p2047_p4 }
 0x334   : > { %p1432_p11 = pneg %p1431_p9 }
 0x336   : > { %1842 = dma.done.wait (%p1432_p11), %s1187_s17, 128  }
 0x337   : > { %1844 = vsyncadd (%p1432_p11), %s1187_s17, 4294967168  ;;  %s2280_s20 = sld [smem:[#allocation25_spill]]  ;;  %p32_p0 = scmp.ge.s32.totalorder %s2017_s14, 6  }
 0x338   : > { %s2281_s27 = sld [smem:[#allocation26_spill]]  ;;  %s2282_s25 = smov %s1851_s26 }
 0x339   : > { %s2284_s28 = smov %s2017_s14  ;;  %34 = sbr.rel (!%p32_p0) target bundleno = 21 (0x15), region = 158 }
 0x33d   : > { %s2283_s26 = smov %s2280_s20 }
 0x33e   :  { %1193 = vsyncpa [#allocation3], 1 }
 0x33f   :  { %1195 = vsyncpa [#allocation3 + $0x1], 1 }
 0x340   :  { %1196 = vsyncpa [#allocation6], 1 }
 0x341   :  { %1198 = vsyncpa [#allocation6 + $0x1], 1 }
 0x342   :  { %1199 = vsyncpa [#allocation9], 1 }
 0x343   :  { %1200 = vsyncpa [#allocation12], 1 }
 0x344   :  { %1201 = vsyncpa [#allocation15], 1 }
 0x345   :  { %1202 = vsyncpa [#allocation4], 1 }
 0x346   :  { %1204 = vsyncpa [#allocation4 + $0x1], 1 }

</bundles_post_ra>
